<compile_context>
chip_gen: v7x
topology: tpu7x:2x2x1
jax: 0.10.0
libtpu: 0.0.40
codegen_flags: <defaults>
</compile_context>

<pallas_src>
import jax
import jax.numpy as jnp
from jax.experimental import pallas as pl
from jax.experimental.pallas import tpu as pltpu


_LANES = 128          # fast (lane) axis width
_MAX_SUBLANES = 32    # 32 sublanes * 128 lanes = 4096 batch elements / block


def _quaternion_kernel(r_ref, o_ref):
    # r_ref: (4, St, 128)  -- [x; y; z; w] component slabs, batch on (St, 128)
    # o_ref: (9, St, 128)  -- rotation-matrix entries (row-major), same layout
    r = r_ref[...].astype(jnp.float32)
    x, y, z, w = r[0], r[1], r[2], r[3]        # each (St, 128), fully dense

    # rsqrt on the EUP + broadcast-free multiplies (instead of sqrt + divide).
    inv = jax.lax.rsqrt(1e-5 + (x * x + y * y + z * z + w * w))
    x = x * inv
    y = y * inv
    z = z * inv
    w = w * inv

    # Shared doubled products (classic quaternion->rotation formulation).
    x2, y2, z2, w2 = x + x, y + y, z + z, w + w
    xx2, yy2, zz2 = x * x2, y * y2, z * z2
    xy2, xz2, yz2 = x * y2, x * z2, y * z2
    xw2, yw2, zw2 = x * w2, y * w2, z * w2

    dt = o_ref.dtype
    # Nine full-slab, unmasked stores (no concatenate / sublane shuffles).
    o_ref[0] = (1.0 - yy2 - zz2).astype(dt)
    o_ref[1] = (xy2 - zw2).astype(dt)
    o_ref[2] = (xz2 + yw2).astype(dt)
    o_ref[3] = (xy2 + zw2).astype(dt)
    o_ref[4] = (1.0 - xx2 - zz2).astype(dt)
    o_ref[5] = (yz2 - xw2).astype(dt)
    o_ref[6] = (xz2 - yw2).astype(dt)
    o_ref[7] = (xw2 + yz2).astype(dt)
    o_ref[8] = (1.0 - xx2 - yy2).astype(dt)


def _pick_sublane_tile(S: int) -> int:
    """Sublane-tile size for the (4, S, 128) batch layout.

    - S <= 8: use the full dim (single block, no (8,) divisibility needed).
    - S >  8: multiple of 8, ~S/2 (>= 2 grid steps so both v7x cores are
      used), capped at _MAX_SUBLANES.
    """
    if S <= 8:
        return S
    half = -(-S // 2)                 # ceil(S / 2)
    half = -(-half // 8) * 8          # round up to a multiple of 8
    return max(8, min(_MAX_SUBLANES, half))


def quaternion_blocks(r3: jax.Array) -> jax.Array:
    """Kernel-native layout: (4, S, 128) -> (9, S, 128), batch = s*128 + l.

    Fused callers that can produce/consume this layout directly avoid the
    wrapper's transpose/pad passes entirely.
    """
    assert r3.ndim == 3 and r3.shape[0] == 4 and r3.shape[2] == _LANES, r3.shape
    S = r3.shape[1]
    st = _pick_sublane_tile(S)

    return pl.pallas_call(
        _quaternion_kernel,
        out_shape=jax.ShapeDtypeStruct((9, S, _LANES), r3.dtype),
        grid_spec=pltpu.PrefetchScalarGridSpec(
            num_scalar_prefetch=0,
            grid=(pl.cdiv(S, st),),
            in_specs=[pl.BlockSpec((4, st, _LANES), lambda s: (0, s, 0))],
            out_specs=pl.BlockSpec((9, st, _LANES), lambda s: (0, s, 0)),
        ),
        compiler_params=pltpu.CompilerParams(
            dimension_semantics=("parallel",)
        ),
    )(r3)


def quaternion(rvec: jax.Array) -> jax.Array:
    """PyTorch contract: rvec (B, 4) -> rotation matrices (B, 3, 3)."""
    assert rvec.ndim == 2 and rvec.shape[1] == 4, rvec.shape
    B = rvec.shape[0]
    Bp = -(-B // _LANES) * _LANES     # pad batch up to a lane multiple
    S = Bp // _LANES

    r = rvec
    if Bp != B:
        # Zero padding: padded columns give theta = sqrt(1e-5) (no NaNs) and
        # are sliced off below.
        r = jnp.pad(r, ((0, Bp - B), (0, 0)))

    r3 = r.T.reshape(4, S, _LANES)            # layout plumbing (XLA fusion)
    out3 = quaternion_blocks(r3)              # (9, S, 128)
    out = out3.reshape(9, Bp)[:, :B]          # (9, B)
    return out.T.reshape(B, 3, 3)             # matches torch.stack(...,1).view(-1,3,3)


def _quaternion_ref(rvec: jax.Array) -> jax.Array:
    """Pure-JAX reference mirroring the PyTorch forward."""
    theta = jnp.sqrt(1e-5 + jnp.sum(rvec ** 2, axis=1))
    r = rvec / theta[:, None]
    x, y, z, w = r[:, 0], r[:, 1], r[:, 2], r[:, 3]
    out = jnp.stack(
        (
            1.0 - 2.0 * y ** 2 - 2.0 * z ** 2,
            2.0 * (x * y - z * w),
            2.0 * (x * z + y * w),
            2.0 * (x * y + z * w),
            1.0 - 2.0 * x ** 2 - 2.0 * z ** 2,
            2.0 * (y * z - x * w),
            2.0 * (x * z - y * w),
            2.0 * (x * w + y * z),
            1.0 - 2.0 * x ** 2 - 2.0 * y ** 2,
        ),
        axis=1,
    )
    return out.reshape(-1, 3, 3)


if __name__ == "__main__":
    key = jax.random.PRNGKey(0)

    # Small shape matching the module's expected input.
    B = 8
    rvec = jax.random.normal(key, (B, 4), dtype=jnp.float32)
    out = jax.block_until_ready(quaternion(rvec))
    ref = _quaternion_ref(rvec)
    assert out.shape == (B, 3, 3), out.shape
    assert jnp.allclose(out, ref, atol=1e-5, rtol=1e-5), (
        float(jnp.max(jnp.abs(out - ref)))
    )

    # Ragged-lane check (B not a multiple of 128, single sublane-block).
    B2 = 300
    rvec2 = jax.random.normal(jax.random.PRNGKey(1), (B2, 4), dtype=jnp.float32)
    out2 = jax.block_until_ready(quaternion(rvec2))
    ref2 = _quaternion_ref(rvec2)
    assert out2.shape == (B2, 3, 3), out2.shape
    assert jnp.allclose(out2, ref2, atol=1e-5, rtol=1e-5), (
        float(jnp.max(jnp.abs(out2 - ref2)))
    )

    # Multi-step grid with a ragged last sublane block (S=9 -> tiles of 8, 1).
    B3 = 1152
    rvec3 = jax.random.normal(jax.random.PRNGKey(2), (B3, 4), dtype=jnp.float32)
    out3 = jax.block_until_ready(quaternion(rvec3))
    ref3 = _quaternion_ref(rvec3)
    assert out3.shape == (B3, 3, 3), out3.shape
    assert jnp.allclose(out3, ref3, atol=1e-5, rtol=1e-5), (
        float(jnp.max(jnp.abs(out3 - ref3)))
    )

    print("KERNEL_OK")
</pallas_src>

<mosaic_0001>
module attributes {stable_mosaic.version = 11 : i64} {
  func.func @_quaternion_kernel(%arg0: i32, %arg1: memref<4x1x128xf32, #tpu.memory_space<vmem>>, %arg2: memref<9x1x128xf32, #tpu.memory_space<vmem>>) attributes {dimension_semantics = [#tpu.dimension_semantics<parallel>], iteration_bounds = array<i64: 1>, scalar_prefetch = 0 : i64, scratch_operands = 0 : i64, tpu.core_type = #tpu.core_type<tc>, window_params = [{transform_indices = @transform_0, window_bounds = array<i64: 4, 1, 128>}, {transform_indices = @transform_1, window_bounds = array<i64: 9, 1, 128>}]} {
    %c0 = arith.constant 0 : index
    %c0_0 = arith.constant 0 : index
    %c0_1 = arith.constant 0 : index
    %0 = vector.load %arg1[%c0, %c0_0, %c0_1] : memref<4x1x128xf32, #tpu.memory_space<vmem>>, vector<4x1x128xf32>
    %1 = vector.extract_strided_slice %0 {offsets = [0, 0, 0], sizes = [1, 1, 128], strides = [1, 1, 1]} : vector<4x1x128xf32> to vector<1x1x128xf32>
    %2 = vector.shape_cast %1 : vector<1x1x128xf32> to vector<1x128xf32>
    %3 = vector.extract_strided_slice %0 {offsets = [1, 0, 0], sizes = [1, 1, 128], strides = [1, 1, 1]} : vector<4x1x128xf32> to vector<1x1x128xf32>
    %4 = vector.shape_cast %3 : vector<1x1x128xf32> to vector<1x128xf32>
    %5 = vector.extract_strided_slice %0 {offsets = [2, 0, 0], sizes = [1, 1, 128], strides = [1, 1, 1]} : vector<4x1x128xf32> to vector<1x1x128xf32>
    %6 = vector.shape_cast %5 : vector<1x1x128xf32> to vector<1x128xf32>
    %7 = vector.extract_strided_slice %0 {offsets = [3, 0, 0], sizes = [1, 1, 128], strides = [1, 1, 1]} : vector<4x1x128xf32> to vector<1x1x128xf32>
    %8 = vector.shape_cast %7 : vector<1x1x128xf32> to vector<1x128xf32>
    %9 = arith.mulf %2, %2 : vector<1x128xf32>
    %10 = arith.mulf %4, %4 : vector<1x128xf32>
    %11 = arith.addf %9, %10 : vector<1x128xf32>
    %12 = arith.mulf %6, %6 : vector<1x128xf32>
    %13 = arith.addf %11, %12 : vector<1x128xf32>
    %14 = arith.mulf %8, %8 : vector<1x128xf32>
    %15 = arith.addf %13, %14 : vector<1x128xf32>
    %cst = arith.constant 9.99999974E-6 : f32
    %16 = vector.broadcast %cst : f32 to vector<1x128xf32>
    %17 = arith.addf %16, %15 : vector<1x128xf32>
    %18 = math.rsqrt %17 : vector<1x128xf32>
    %19 = arith.mulf %2, %18 : vector<1x128xf32>
    %20 = arith.mulf %4, %18 : vector<1x128xf32>
    %21 = arith.mulf %6, %18 : vector<1x128xf32>
    %22 = arith.mulf %8, %18 : vector<1x128xf32>
    %23 = arith.addf %19, %19 : vector<1x128xf32>
    %24 = arith.addf %20, %20 : vector<1x128xf32>
    %25 = arith.addf %21, %21 : vector<1x128xf32>
    %26 = arith.addf %22, %22 : vector<1x128xf32>
    %27 = arith.mulf %19, %23 : vector<1x128xf32>
    %28 = arith.mulf %20, %24 : vector<1x128xf32>
    %29 = arith.mulf %21, %25 : vector<1x128xf32>
    %30 = arith.mulf %19, %24 : vector<1x128xf32>
    %31 = arith.mulf %19, %25 : vector<1x128xf32>
    %32 = arith.mulf %20, %25 : vector<1x128xf32>
    %33 = arith.mulf %19, %26 : vector<1x128xf32>
    %34 = arith.mulf %20, %26 : vector<1x128xf32>
    %35 = arith.mulf %21, %26 : vector<1x128xf32>
    %cst_2 = arith.constant 1.000000e+00 : f32
    %36 = vector.broadcast %cst_2 : f32 to vector<1x128xf32>
    %37 = arith.subf %36, %28 : vector<1x128xf32>
    %38 = arith.subf %37, %29 : vector<1x128xf32>
    %c0_3 = arith.constant 0 : index
    %c0_4 = arith.constant 0 : index
    %c0_5 = arith.constant 0 : index
    %39 = vector.load %arg2[%c0_3, %c0_4, %c0_5] : memref<9x1x128xf32, #tpu.memory_space<vmem>>, vector<1x1x128xf32>
    %40 = vector.shape_cast %39 : vector<1x1x128xf32> to vector<1x128xf32>
    %41 = vector.shape_cast %38 : vector<1x128xf32> to vector<1x1x128xf32>
    tpu.vector_store %arg2[%c0_3, %c0_4, %c0_5], %41 {strides = array<i32>} : memref<9x1x128xf32, #tpu.memory_space<vmem>>, vector<1x1x128xf32>,
    %42 = arith.subf %30, %35 : vector<1x128xf32>
    %c1 = arith.constant 1 : index
    %c0_6 = arith.constant 0 : index
    %c0_7 = arith.constant 0 : index
    %43 = vector.load %arg2[%c1, %c0_6, %c0_7] : memref<9x1x128xf32, #tpu.memory_space<vmem>>, vector<1x1x128xf32>
    %44 = vector.shape_cast %43 : vector<1x1x128xf32> to vector<1x128xf32>
    %45 = vector.shape_cast %42 : vector<1x128xf32> to vector<1x1x128xf32>
    tpu.vector_store %arg2[%c1, %c0_6, %c0_7], %45 {strides = array<i32>} : memref<9x1x128xf32, #tpu.memory_space<vmem>>, vector<1x1x128xf32>,
    %46 = arith.addf %31, %34 : vector<1x128xf32>
    %c2 = arith.constant 2 : index
    %c0_8 = arith.constant 0 : index
    %c0_9 = arith.constant 0 : index
    %47 = vector.load %arg2[%c2, %c0_8, %c0_9] : memref<9x1x128xf32, #tpu.memory_space<vmem>>, vector<1x1x128xf32>
    %48 = vector.shape_cast %47 : vector<1x1x128xf32> to vector<1x128xf32>
    %49 = vector.shape_cast %46 : vector<1x128xf32> to vector<1x1x128xf32>
    tpu.vector_store %arg2[%c2, %c0_8, %c0_9], %49 {strides = array<i32>} : memref<9x1x128xf32, #tpu.memory_space<vmem>>, vector<1x1x128xf32>,
    %50 = arith.addf %30, %35 : vector<1x128xf32>
    %c3 = arith.constant 3 : index
    %c0_10 = arith.constant 0 : index
    %c0_11 = arith.constant 0 : index
    %51 = vector.load %arg2[%c3, %c0_10, %c0_11] : memref<9x1x128xf32, #tpu.memory_space<vmem>>, vector<1x1x128xf32>
    %52 = vector.shape_cast %51 : vector<1x1x128xf32> to vector<1x128xf32>
    %53 = vector.shape_cast %50 : vector<1x128xf32> to vector<1x1x128xf32>
    tpu.vector_store %arg2[%c3, %c0_10, %c0_11], %53 {strides = array<i32>} : memref<9x1x128xf32, #tpu.memory_space<vmem>>, vector<1x1x128xf32>,
    %cst_12 = arith.constant 1.000000e+00 : f32
    %54 = vector.broadcast %cst_12 : f32 to vector<1x128xf32>
    %55 = arith.subf %54, %27 : vector<1x128xf32>
    %56 = arith.subf %55, %29 : vector<1x128xf32>
    %c4 = arith.constant 4 : index
    %c0_13 = arith.constant 0 : index
    %c0_14 = arith.constant 0 : index
    %57 = vector.load %arg2[%c4, %c0_13, %c0_14] : memref<9x1x128xf32, #tpu.memory_space<vmem>>, vector<1x1x128xf32>
    %58 = vector.shape_cast %57 : vector<1x1x128xf32> to vector<1x128xf32>
    %59 = vector.shape_cast %56 : vector<1x128xf32> to vector<1x1x128xf32>
    tpu.vector_store %arg2[%c4, %c0_13, %c0_14], %59 {strides = array<i32>} : memref<9x1x128xf32, #tpu.memory_space<vmem>>, vector<1x1x128xf32>,
    %60 = arith.subf %32, %33 : vector<1x128xf32>
    %c5 = arith.constant 5 : index
    %c0_15 = arith.constant 0 : index
    %c0_16 = arith.constant 0 : index
    %61 = vector.load %arg2[%c5, %c0_15, %c0_16] : memref<9x1x128xf32, #tpu.memory_space<vmem>>, vector<1x1x128xf32>
    %62 = vector.shape_cast %61 : vector<1x1x128xf32> to vector<1x128xf32>
    %63 = vector.shape_cast %60 : vector<1x128xf32> to vector<1x1x128xf32>
    tpu.vector_store %arg2[%c5, %c0_15, %c0_16], %63 {strides = array<i32>} : memref<9x1x128xf32, #tpu.memory_space<vmem>>, vector<1x1x128xf32>,
    %64 = arith.subf %31, %34 : vector<1x128xf32>
    %c6 = arith.constant 6 : index
    %c0_17 = arith.constant 0 : index
    %c0_18 = arith.constant 0 : index
    %65 = vector.load %arg2[%c6, %c0_17, %c0_18] : memref<9x1x128xf32, #tpu.memory_space<vmem>>, vector<1x1x128xf32>
    %66 = vector.shape_cast %65 : vector<1x1x128xf32> to vector<1x128xf32>
    %67 = vector.shape_cast %64 : vector<1x128xf32> to vector<1x1x128xf32>
    tpu.vector_store %arg2[%c6, %c0_17, %c0_18], %67 {strides = array<i32>} : memref<9x1x128xf32, #tpu.memory_space<vmem>>, vector<1x1x128xf32>,
    %68 = arith.addf %33, %32 : vector<1x128xf32>
    %c7 = arith.constant 7 : index
    %c0_19 = arith.constant 0 : index
    %c0_20 = arith.constant 0 : index
    %69 = vector.load %arg2[%c7, %c0_19, %c0_20] : memref<9x1x128xf32, #tpu.memory_space<vmem>>, vector<1x1x128xf32>
    %70 = vector.shape_cast %69 : vector<1x1x128xf32> to vector<1x128xf32>
    %71 = vector.shape_cast %68 : vector<1x128xf32> to vector<1x1x128xf32>
    tpu.vector_store %arg2[%c7, %c0_19, %c0_20], %71 {strides = array<i32>} : memref<9x1x128xf32, #tpu.memory_space<vmem>>, vector<1x1x128xf32>,
    %cst_21 = arith.constant 1.000000e+00 : f32
    %72 = vector.broadcast %cst_21 : f32 to vector<1x128xf32>
    %73 = arith.subf %72, %27 : vector<1x128xf32>
    %74 = arith.subf %73, %28 : vector<1x128xf32>
    %c8 = arith.constant 8 : index
    %c0_22 = arith.constant 0 : index
    %c0_23 = arith.constant 0 : index
    %75 = vector.load %arg2[%c8, %c0_22, %c0_23] : memref<9x1x128xf32, #tpu.memory_space<vmem>>, vector<1x1x128xf32>
    %76 = vector.shape_cast %75 : vector<1x1x128xf32> to vector<1x128xf32>
    %77 = vector.shape_cast %74 : vector<1x128xf32> to vector<1x1x128xf32>
    tpu.vector_store %arg2[%c8, %c0_22, %c0_23], %77 {strides = array<i32>} : memref<9x1x128xf32, #tpu.memory_space<vmem>>, vector<1x1x128xf32>,
    return
  }
  func.func @transform_0(%arg0: i32) -> (i32, i32, i32) {
    %c0_i32 = arith.constant 0 : i32
    %c0_i32_0 = arith.constant 0 : i32
    %c0_i32_1 = arith.constant 0 : i32
    return %c0_i32, %arg0, %c0_i32_0 : i32, i32, i32
  }
  func.func @transform_1(%arg0: i32) -> (i32, i32, i32) {
    %c0_i32 = arith.constant 0 : i32
    %c0_i32_0 = arith.constant 0 : i32
    %c0_i32_1 = arith.constant 0 : i32
    return %c0_i32, %arg0, %c0_i32_0 : i32, i32, i32
  }
}

</mosaic_0001>

<bundles_post_ra>
// kernel: tpu_custom_call.1
= control target key start
LH: loop header
LB: loop body
LE: loop exit
PB: predicated region body
PF: predicated region fallthrough
CT: control target
= control target key end

     0   :  { %6 = vsyncpa [#allocation3], 0  ;;  %s196_s0 = inlined_call_operand.hbm [shape: f32[4,1,128], index: 0, kind: input, shape index: {}]   ;;  %s197_s1 = inlined_call_operand.hbm [shape: f32[9,1,128], index: 1, kind: output, shape index: {}]  }
   0x1   :  { %7 = vsyncpa [#allocation4], 0  ;;  %s152_s6 = smov [#allocation2]   ;;  %s104_s10 = scalar_lea.hbm %s196_s0, 64 }
   0x2   :  { %s13_s7 = sshll.u32 %s152_s6, 4  ;;  %p105_p0 = scmp.ne.s32.totalorder %s196_s0, %s104_s10  ;;  %s14_s7 = int_to_ptr.vmem [resolvable:$true] %s13_s7 }
   0x3   :  { %p108_p1 = scmp.lt.u32.totalorder %s104_s10, %s196_s0 }
   0x5   :  { %p110_p2 = pnand %p108_p1, %p105_p0 }
   0x7   :  { %113 = shalt.err (!%p110_p2)
}
   0x8   :  { %s114_s15 = scalar_lea.vmem %s14_s7, 64  ;;  %p119_p4 = scmp.lt.s32.totalorder %s14_s7, %s14_s7 }
   0x9   :  { %p115_p3 = scmp.ne.s32.totalorder %s14_s7, %s114_s15  ;;  %p120_p5 = scmp.lt.s32.totalorder %s114_s15, %s114_s15 }
   0xb   :  { %p121_p6 = por %p120_p5, %p119_p4 }
   0xd   :  { %p122_p7 = pnand %p121_p6, %p115_p3 }
   0xf   :  { %125 = shalt.err (!%p122_p7)
}
  0x10   :  { %s153_s16 = smov 16   ;;  %s154_s17 = smov 1  }
  0x11   :  { %19 = dma.hbm_to_vmem [thread:$0]  %s196_s0, 64, %s14_s7, [#allocation3], %s153_s16, %s153_s16, %s154_s17  }
  0x12   :  { %148 = dma.done.wait [#allocation3], 64  }
  0x13   :  { %149 = vsyncadd [#allocation3], 4294967232  ;;  %v23_v0 = vld [vmem:[#allocation2] sm:$0x1]  ;;  %v24_v1 = vld [vmem:[#allocation2 + $0x1] sm:$0x1] }
  0x14   :  { %v25_v2 = vld [vmem:[#allocation2 + $0x2] sm:$0x1]  ;;  %v26_v3 = vld [vmem:[#allocation2 + $0x3] sm:$0x1]  ;;  %v27_v4 = vmul.f32 %v23_v0, %v23_v0  ;;  %v28_v5 = vmul.f32 %v24_v1, %v24_v1  ;;  %s155_s0 = smov [#allocation5]  }
  0x15   :  { %v30_v6 = vmul.f32 %v25_v2, %v25_v2  ;;  %v32_v8 = vmul.f32 %v26_v3, %v26_v3  ;;  %s86_s20 = sshll.u32 %s155_s0, 4  ;;  %s87_s20 = int_to_ptr.vmem [resolvable:$true] %s86_s20 }
  0x16   :  { %v29_v7 = vadd.f32 %v28_v5, %v27_v4  ;;  %s126_s21 = scalar_lea.vmem %s87_s20, 144  ;;  %s130_s22 = scalar_lea.vmem %s87_s20, 160 }
  0x17   :  { %p127_p8 = scmp.ne.s32.totalorder %s87_s20, %s126_s21  ;;  %p131_p9 = scmp.lt.s32.totalorder %s87_s20, %s87_s20 }
  0x18   :  { %v31_v9 = vadd.f32 %v30_v6, %v29_v7  ;;  %p132_p10 = scmp.lt.s32.totalorder %s130_s22, %s126_s21 }
  0x1a   :  { %v33_v10 = vadd.f32 %v32_v8, %v31_v9  ;;  %p133_p11 = por %p132_p10, %p131_p9 }
  0x1c   :  { %v34_v11 = vadd.f32 1e-05, %v33_v10  ;;  %p134_p12 = pnand %p133_p11, %p127_p8 }
  0x1e   :  { %102 = vrsqrt.f32 %v34_v11 }
  0x28   :  { %v103_v12 = vpop.eup %102 }
  0x29   :  { %v37_v13 = vmul.f32 %v103_v12, %v24_v1  ;;  %v38_v14 = vmul.f32 %v103_v12, %v25_v2  ;;  %v36_v15 = vmul.f32 %v103_v12, %v23_v0  ;;  %v39_v16 = vmul.f32 %v103_v12, %v26_v3 }
  0x2b   :  { %v41_v17 = vadd.f32 %v37_v13, %v37_v13  ;;  %v42_v18 = vadd.f32 %v38_v14, %v38_v14  ;;  %v43_v19 = vadd.f32 %v39_v16, %v39_v16  ;;  %v40_v20 = vadd.f32 %v36_v15, %v36_v15 }
  0x2d   :  { %v45_v21 = vmul.f32 %v41_v17, %v37_v13  ;;  %v46_v22 = vmul.f32 %v42_v18, %v38_v14  ;;  %v47_v23 = vmul.f32 %v41_v17, %v36_v15  ;;  %v52_v24 = vmul.f32 %v43_v19, %v38_v14 }
  0x2e   :  { %v48_v25 = vmul.f32 %v42_v18, %v36_v15  ;;  %v51_v26 = vmul.f32 %v43_v19, %v37_v13  ;;  %v44_v27 = vmul.f32 %v40_v20, %v36_v15  ;;  %v49_v28 = vmul.f32 %v42_v18, %v37_v13 }
  0x2f   :  { %v53_v29 = vsub.f32 1.0, %v45_v21  ;;  %v56_v30 = vsub.f32 %v47_v23, %v52_v24  ;;  %v62_v31 = vadd.f32 %v52_v24, %v47_v23  ;;  %v50_v32 = vmul.f32 %v43_v19, %v36_v15 }
  0x30   :  { %v59_v33 = vadd.f32 %v51_v26, %v48_v25  ;;  %v65_v34 = vsub.f32 1.0, %v44_v27  ;;  %v72_v35 = vsub.f32 %v48_v25, %v51_v26 }
  0x31   :  { %v54_v36 = vsub.f32 %v53_v29, %v46_v22  ;;  %58 = vst [vmem:[#allocation5 + $0x1] sm:$0x1] %v56_v30  ;;  %64 = vst [vmem:[#allocation5 + $0x3] sm:$0x1] %v62_v31  ;;  %v69_v37 = vsub.f32 %v49_v28, %v50_v32  ;;  %v75_v38 = vadd.f32 %v50_v32, %v49_v28 }
  0x32   :  { %61 = vst [vmem:[#allocation5 + $0x2] sm:$0x1] %v59_v33  ;;  %v66_v39 = vsub.f32 %v65_v34, %v46_v22  ;;  %74 = vst [vmem:[#allocation5 + $0x6] sm:$0x1] %v72_v35  ;;  %v78_v40 = vsub.f32 %v65_v34, %v45_v21 }
  0x33   :  { %55 = vst [vmem:[#allocation5] sm:$0x1] %v54_v36  ;;  %71 = vst [vmem:[#allocation5 + $0x5] sm:$0x1] %v69_v37 }
  0x34   :  { %77 = vst [vmem:[#allocation5 + $0x7] sm:$0x1] %v75_v38  ;;  %68 = vst [vmem:[#allocation5 + $0x4] sm:$0x1] %v66_v39 }
  0x35   :  { %80 = vst [vmem:[#allocation5 + $0x8] sm:$0x1] %v78_v40 }
  0x36   :  { %137 = shalt.err (!%p134_p12)
}
  0x37   :  { %s138_s25 = scalar_lea.hbm %s197_s1, 144 }
  0x38   :  { %p139_p13 = scmp.ne.s32.totalorder %s197_s1, %s138_s25  ;;  %p142_p0 = scmp.lt.u32.totalorder %s138_s25, %s197_s1 }
  0x3a   :  { %p144_p1 = pnand %p142_p0, %p139_p13 }
  0x3c   :  { %147 = shalt.err (!%p144_p1)
}
  0x3d   :  { %92 = dma.vmem_to_hbm [thread:$0]  %s87_s20, 144, %s197_s1, [#allocation4], %s153_s16, %s153_s16, %s154_s17  }
  0x3e   :  { %150 = dma.done.wait [#allocation4], 144  }
  0x3f   :  { %151 = vsyncadd [#allocation4], 4294967152 }
  0x40   :  { %96 = vsyncpa [#allocation3], 1 }
  0x41   :  { %97 = vsyncpa [#allocation4], 1 }

</bundles_post_ra>
